<compile_context>
chip_gen: v5e
topology: v5e:2x2
jax: 0.10.0
libtpu: 0.0.40
codegen_flags: <defaults>
</compile_context>

<pallas_src>
import functools

import jax
import jax.numpy as jnp
from jax import lax
from jax.experimental import pallas as pl
from jax.experimental.pallas import tpu as pltpu


_MIN_SPLIT_PIXELS = 8192   # only split the grid if each step keeps >= this many pixels


def _round_up(a, b):
    return ((a + b - 1) // b) * b


def _cdiv(a, b):
    return -(-a // b)


def _gelu(x, approximate):
    if approximate:
        # tanh form -> EUP slot (VALU stays free for the rest of the kernel).
        return jax.nn.gelu(x, approximate=True)
    # PyTorch nn.GELU() default: exact erf-based GELU (VPU polynomial).
    return 0.5 * x * (1.0 + lax.erf(x * 0.7071067811865476))


def color_mlp_kernel(x_ref, w_ref, b_ref, out_ref, *, approximate):
    # x block: (rows, 24) = 8 pixels per row, lanes = [r0,g0,b0, r1,g1,b1, ...].
    # Weights are block-diagonal kron(I_8, W) so each pixel sees its own copy;
    # all intermediate activations are fully lane-dense (rows, 128) tiles.
    x = x_ref[...]                                # (rows, 24)

    w1 = w_ref[0][:24, :]                         # (24, 128)  kron(I8, W1)
    w23 = w_ref[1]                                # (128, 128) kron(I8, W2 @ W3)
    w4 = w_ref[2]                                 # (128, 128) kron(I8, W4), cols 24: zero
    b1 = b_ref[0:1, :]                            # (1, 128)
    b23 = b_ref[1:2, :]                           # (1, 128)
    b4 = b_ref[2:3, :]                            # (1, 128), cols 24: zero

    h = jnp.dot(x, w1, preferred_element_type=jnp.float32) + b1
    h = _gelu(h, approximate)                     # (rows, 128), lane-dense

    d = jnp.dot(h, w23, preferred_element_type=jnp.float32) + b23
    d = _gelu(d, approximate)                     # (rows, 128), lane-dense

    y = jnp.dot(d, w4, preferred_element_type=jnp.float32) + b4
    out_ref[...] = jax.nn.sigmoid(y[:, :24])      # back to 8 interleaved pixels


@functools.partial(jax.jit, static_argnames=("tile_n", "approximate_gelu"))
def color_mlp_forward(x, params, tile_n=16384, approximate_gelu=False):
    """x: (N, 3) float32 RGB. params: dict of (in,out) weights / (1,out) biases."""
    n, in_dim = x.shape
    assert in_dim == 3

    # --- fold + block-diagonalize parameters (tiny; fused by XLA) ------------
    w23 = params["w2"] @ params["w3"]                       # (16, 16), exact fold
    b23 = params["b2"] @ params["w3"] + params["b3"]        # (1, 16)

    eye8 = jnp.eye(8, dtype=jnp.float32)
    w1_big = jnp.kron(eye8, params["w1"])                   # (24, 128)
    w23_big = jnp.kron(eye8, w23)                           # (128, 128)
    w4_big = jnp.kron(eye8, params["w4"])                   # (128, 24)

    w_slab = jnp.stack([
        jnp.pad(w1_big, ((0, 104), (0, 0))),                # (128, 128)
        w23_big,                                            # (128, 128)
        jnp.pad(w4_big, ((0, 0), (0, 104))),                # (128, 128)
    ])                                                      # (3, 128, 128)

    b_slab = jnp.concatenate([
        jnp.tile(params["b1"], (1, 8)),                     # (1, 128)
        jnp.tile(b23, (1, 8)),                              # (1, 128)
        jnp.pad(jnp.tile(params["b4"], (1, 8)), ((0, 0), (0, 104))),
    ], axis=0)                                              # (3, 128)

    # --- tile sizing ----------------------------------------------------------
    # Split the 1-D grid only when each step keeps substantial work (v7x has
    # 2 TCs; v5e/v6e are single-TC, so extra steps are pure overhead there).
    n128 = _round_up(n, 128)
    steps = _cdiv(n128, tile_n)
    if n128 >= 2 * _MIN_SPLIT_PIXELS:
        steps = max(steps, 2)
        steps += steps % 2                                  # balanced even grid
    tile = _round_up(_cdiv(n128, steps), 128)               # pixels per step
    grid = _cdiv(n128, tile)
    n_pad = grid * tile                                     # bounded padding
    rows = tile // 8                                        # sublane rows per step

    # Pad (only if needed) and reshape to the packed (N/8, 24) slab.  The
    # reshape of a contiguous row-major array is free (no HBM relayout pass).
    x_packed = jnp.pad(x, ((0, n_pad - n), (0, 0))).reshape(n_pad // 8, 24)

    kernel = functools.partial(color_mlp_kernel, approximate=approximate_gelu)

    out_packed = pl.pallas_call(
        kernel,
        out_shape=jax.ShapeDtypeStruct((n_pad // 8, 24), jnp.float32),
        grid_spec=pltpu.PrefetchScalarGridSpec(
            num_scalar_prefetch=0,
            grid=(grid,),
            in_specs=[
                pl.BlockSpec((rows, 24), lambda i: (i, 0)),
                pl.BlockSpec((3, 128, 128), lambda i: (0, 0, 0)),
                pl.BlockSpec((3, 128), lambda i: (0, 0)),
            ],
            out_specs=pl.BlockSpec((rows, 24), lambda i: (i, 0)),
        ),
        compiler_params=pltpu.CompilerParams(
            dimension_semantics=("parallel",),
            vmem_limit_bytes=32 * 1024 * 1024,   # headroom for tile_n up to ~32768
        ),
    )(x_packed, w_slab, b_slab)

    # Reshape back (free) and drop the padded pixels.
    return out_packed.reshape(n_pad, 3)[:n]


def init_params(key, n_bottleneck):
    """Deterministic init mimicking PyTorch nn.Linear default
    (uniform(-1/sqrt(fan_in), 1/sqrt(fan_in))). Weights stored as (in, out)."""
    dims = [(3, 16), (16, n_bottleneck), (n_bottleneck, 16), (16, 3)]
    params = {}
    for idx, (fan_in, fan_out) in enumerate(dims, start=1):
        key, kw, kb = jax.random.split(key, 3)
        bound = 1.0 / jnp.sqrt(jnp.float32(fan_in))
        params[f"w{idx}"] = jax.random.uniform(
            kw, (fan_in, fan_out), jnp.float32, -bound, bound)
        params[f"b{idx}"] = jax.random.uniform(
            kb, (1, fan_out), jnp.float32, -bound, bound)
    return params


def color_mlp_reference(x, params, approximate_gelu=False):
    """Pure-JAX reference (unfused, unpacked) for correctness checking."""
    h = _gelu(x @ params["w1"] + params["b1"], approximate_gelu)
    z = h @ params["w2"] + params["b2"]
    d = _gelu(z @ params["w3"] + params["b3"], approximate_gelu)
    return jax.nn.sigmoid(d @ params["w4"] + params["b4"])


if __name__ == "__main__":
    key = jax.random.PRNGKey(0)
    n_bottleneck = 4
    batch = 256

    k_params, k_x = jax.random.split(key)
    params = init_params(k_params, n_bottleneck)
    x = jax.random.uniform(k_x, (batch, 3), jnp.float32)        # RGB in [0, 1)

    # Exact-erf GELU (PyTorch parity).  Only fp-reassociation-level differences
    # from the W2@W3 fold and the block-diagonal packing.
    out = jax.block_until_ready(color_mlp_forward(x, params))
    ref = color_mlp_reference(x, params)
    assert out.shape == (batch, 3), out.shape
    assert jnp.allclose(out, ref, atol=1e-5, rtol=1e-5), \
        float(jnp.max(jnp.abs(out - ref)))

    # Fast tanh-approx GELU path (EUP); compare against the matching reference.
    out_fast = jax.block_until_ready(
        color_mlp_forward(x, params, approximate_gelu=True))
    ref_fast = color_mlp_reference(x, params, approximate_gelu=True)
    assert jnp.allclose(out_fast, ref_fast, atol=1e-5, rtol=1e-5), \
        float(jnp.max(jnp.abs(out_fast - ref_fast)))

    # Unaligned batch exercises the (bounded) padding path.
    x_odd = x[:200]
    out_odd = jax.block_until_ready(color_mlp_forward(x_odd, params))
    assert out_odd.shape == (200, 3), out_odd.shape
    assert jnp.allclose(out_odd, ref[:200], atol=1e-5, rtol=1e-5)

    print("KERNEL_OK")
</pallas_src>

<mosaic_0001>
module attributes {stable_mosaic.version = 11 : i64} {
  func.func @color_mlp_kernel(%arg0: i32, %arg1: memref<32x24xf32, #tpu.memory_space<vmem>>, %arg2: memref<3x128x128xf32, #tpu.memory_space<vmem>>, %arg3: memref<3x128xf32, #tpu.memory_space<vmem>>, %arg4: memref<32x24xf32, #tpu.memory_space<vmem>>) attributes {dimension_semantics = [#tpu.dimension_semantics<parallel>], iteration_bounds = array<i64: 1>, scalar_prefetch = 0 : i64, scratch_operands = 0 : i64, tpu.core_type = #tpu.core_type<tc>, window_params = [{transform_indices = @transform_0, window_bounds = array<i64: 32, 24>}, {pipeline_mode = #tpu.pipeline_mode<synchronous>, transform_indices = @transform_1, window_bounds = array<i64: 3, 128, 128>}, {pipeline_mode = #tpu.pipeline_mode<synchronous>, transform_indices = @transform_2, window_bounds = array<i64: 3, 128>}, {transform_indices = @transform_3, window_bounds = array<i64: 32, 24>}]} {
    %c0 = arith.constant 0 : index
    %c0_0 = arith.constant 0 : index
    %0 = vector.load %arg1[%c0, %c0_0] : memref<32x24xf32, #tpu.memory_space<vmem>>, vector<32x24xf32>
    %c0_1 = arith.constant 0 : index
    %c0_2 = arith.constant 0 : index
    %c0_3 = arith.constant 0 : index
    %1 = vector.load %arg2[%c0_1, %c0_2, %c0_3] : memref<3x128x128xf32, #tpu.memory_space<vmem>>, vector<1x128x128xf32>
    %2 = vector.shape_cast %1 : vector<1x128x128xf32> to vector<128x128xf32>
    %3 = vector.extract_strided_slice %2 {offsets = [0, 0], sizes = [24, 128], strides = [1, 1]} : vector<128x128xf32> to vector<24x128xf32>
    %c1 = arith.constant 1 : index
    %c0_4 = arith.constant 0 : index
    %c0_5 = arith.constant 0 : index
    %4 = vector.load %arg2[%c1, %c0_4, %c0_5] : memref<3x128x128xf32, #tpu.memory_space<vmem>>, vector<1x128x128xf32>
    %5 = vector.shape_cast %4 : vector<1x128x128xf32> to vector<128x128xf32>
    %c2 = arith.constant 2 : index
    %c0_6 = arith.constant 0 : index
    %c0_7 = arith.constant 0 : index
    %6 = vector.load %arg2[%c2, %c0_6, %c0_7] : memref<3x128x128xf32, #tpu.memory_space<vmem>>, vector<1x128x128xf32>
    %7 = vector.shape_cast %6 : vector<1x128x128xf32> to vector<128x128xf32>
    %c0_8 = arith.constant 0 : index
    %c0_9 = arith.constant 0 : index
    %8 = vector.load %arg3[%c0_8, %c0_9] : memref<3x128xf32, #tpu.memory_space<vmem>>, vector<1x128xf32>
    %c1_10 = arith.constant 1 : index
    %c0_11 = arith.constant 0 : index
    %9 = vector.load %arg3[%c1_10, %c0_11] : memref<3x128xf32, #tpu.memory_space<vmem>>, vector<1x128xf32>
    %c2_12 = arith.constant 2 : index
    %c0_13 = arith.constant 0 : index
    %10 = vector.load %arg3[%c2_12, %c0_13] : memref<3x128xf32, #tpu.memory_space<vmem>>, vector<1x128xf32>
    %cst = arith.constant dense<0.000000e+00> : vector<32x128xf32>
    %11 = tpu.matmul %0, %3, %cst {dimension_numbers = #tpu.dot_dimension_numbers<[1], [0], [0], [1], [0, 0, 1, 1], [], []>} : vector<32x24xf32>, vector<24x128xf32>, vector<32x128xf32> -> vector<32x128xf32>
    %12 = vector.broadcast %8 : vector<1x128xf32> to vector<32x128xf32>
    %13 = arith.addf %11, %12 : vector<32x128xf32>
    %cst_14 = arith.constant 5.000000e-01 : f32
    %14 = vector.broadcast %cst_14 : f32 to vector<32x128xf32>
    %15 = arith.mulf %14, %13 : vector<32x128xf32>
    %cst_15 = arith.constant 0.707106769 : f32
    %16 = vector.broadcast %cst_15 : f32 to vector<32x128xf32>
    %17 = arith.mulf %13, %16 : vector<32x128xf32>
    %18 = math.erf %17 : vector<32x128xf32>
    %cst_16 = arith.constant 1.000000e+00 : f32
    %19 = vector.broadcast %cst_16 : f32 to vector<32x128xf32>
    %20 = arith.addf %19, %18 : vector<32x128xf32>
    %21 = arith.mulf %15, %20 : vector<32x128xf32>
    %cst_17 = arith.constant dense<0.000000e+00> : vector<32x128xf32>
    %22 = tpu.matmul %21, %5, %cst_17 {dimension_numbers = #tpu.dot_dimension_numbers<[1], [0], [0], [1], [0, 0, 1, 1], [], []>} : vector<32x128xf32>, vector<128x128xf32>, vector<32x128xf32> -> vector<32x128xf32>
    %23 = vector.broadcast %9 : vector<1x128xf32> to vector<32x128xf32>
    %24 = arith.addf %22, %23 : vector<32x128xf32>
    %cst_18 = arith.constant 5.000000e-01 : f32
    %25 = vector.broadcast %cst_18 : f32 to vector<32x128xf32>
    %26 = arith.mulf %25, %24 : vector<32x128xf32>
    %cst_19 = arith.constant 0.707106769 : f32
    %27 = vector.broadcast %cst_19 : f32 to vector<32x128xf32>
    %28 = arith.mulf %24, %27 : vector<32x128xf32>
    %29 = math.erf %28 : vector<32x128xf32>
    %cst_20 = arith.constant 1.000000e+00 : f32
    %30 = vector.broadcast %cst_20 : f32 to vector<32x128xf32>
    %31 = arith.addf %30, %29 : vector<32x128xf32>
    %32 = arith.mulf %26, %31 : vector<32x128xf32>
    %cst_21 = arith.constant dense<0.000000e+00> : vector<32x128xf32>
    %33 = tpu.matmul %32, %7, %cst_21 {dimension_numbers = #tpu.dot_dimension_numbers<[1], [0], [0], [1], [0, 0, 1, 1], [], []>} : vector<32x128xf32>, vector<128x128xf32>, vector<32x128xf32> -> vector<32x128xf32>
    %34 = vector.broadcast %10 : vector<1x128xf32> to vector<32x128xf32>
    %35 = arith.addf %33, %34 : vector<32x128xf32>
    %36 = vector.extract_strided_slice %35 {offsets = [0, 0], sizes = [32, 24], strides = [1, 1]} : vector<32x128xf32> to vector<32x24xf32>
    %37 = arith.negf %36 : vector<32x24xf32>
    %38 = math.exp %37 : vector<32x24xf32>
    %cst_22 = arith.constant 1.000000e+00 : f32
    %39 = vector.broadcast %cst_22 : f32 to vector<32x24xf32>
    %40 = arith.addf %39, %38 : vector<32x24xf32>
    %41 = arith.divf %39, %40 : vector<32x24xf32>
    %c0_23 = arith.constant 0 : index
    %c0_24 = arith.constant 0 : index
    %42 = vector.load %arg4[%c0_23, %c0_24] : memref<32x24xf32, #tpu.memory_space<vmem>>, vector<32x24xf32>
    tpu.vector_store %arg4[%c0_23, %c0_24], %41 {strides = array<i32>} : memref<32x24xf32, #tpu.memory_space<vmem>>, vector<32x24xf32>,
    return
  }
  func.func @transform_0(%arg0: i32) -> (i32, i32) {
    %c0_i32 = arith.constant 0 : i32
    %c0_i32_0 = arith.constant 0 : i32
    return %arg0, %c0_i32 : i32, i32
  }
  func.func @transform_1(%arg0: i32) -> (i32, i32, i32) {
    %c0_i32 = arith.constant 0 : i32
    %c0_i32_0 = arith.constant 0 : i32
    %c0_i32_1 = arith.constant 0 : i32
    %c0_i32_2 = arith.constant 0 : i32
    return %c0_i32, %c0_i32_0, %c0_i32_1 : i32, i32, i32
  }
  func.func @transform_2(%arg0: i32) -> (i32, i32) {
    %c0_i32 = arith.constant 0 : i32
    %c0_i32_0 = arith.constant 0 : i32
    %c0_i32_1 = arith.constant 0 : i32
    return %c0_i32, %c0_i32_0 : i32, i32
  }
  func.func @transform_3(%arg0: i32) -> (i32, i32) {
    %c0_i32 = arith.constant 0 : i32
    %c0_i32_0 = arith.constant 0 : i32
    return %arg0, %c0_i32 : i32, i32
  }
}

</mosaic_0001>

<bundles_post_ra>
// kernel: color_mlp_forward.1
= control target key start
LH: loop header
LB: loop body
LE: loop exit
PB: predicated region body
PF: predicated region fallthrough
CT: control target
= control target key end

     0   :  { %vm59_vm0 = vcmask 195584   ;;  %s1058_s1 = inlined_call_operand.vmem [shape: f32[3,128,128], index: 1, kind: input, shape index: {}]   ;;  %s1059_s0 = inlined_call_operand.vmem [shape: f32[32,24], index: 0, kind: input, shape index: {}]   ;;  %s1060_s2 = inlined_call_operand.vmem [shape: f32[3,128], index: 2, kind: input, shape index: {}]   ;;  %s1061_s3 = inlined_call_operand.vmem [shape: f32[32,24], index: 3, kind: output, shape index: {}]  }
   0x1   :  { %v20_v0 = vld [vmem:[%s1058_s1 + $0x10] sm:$0xff]  ;;  %v19_v1 = vld [vmem:[%s1058_s1 + $0x8] sm:$0xff]  ;;  %v18_v2 = vld [vmem:[%s1058_s1] sm:$0xff] }
   0x2   :  { %85 = vmatpush.msra.mxu0 %v20_v0  ;;  %v14_v3 = vld [vmem:[%s1059_s0] sm:$0xff]  ;;  %v15_v4 = vld [vmem:[%s1059_s0 + $0x8] sm:$0xff]  ;;  %v16_v5 = vld [vmem:[%s1059_s0 + $0x10] sm:$0xff] }
   0x3   :  { %v17_v6 = vld [vmem:[%s1059_s0 + $0x18] sm:$0xff]  ;;  %v611_v8 = vld [vmem:[%s1058_s1 + $0xf0] sm:$0xff]  ;;  %v610_v9 = vld [vmem:[%s1058_s1 + $0xe8] sm:$0xff] }
   0x4   :  { %86 = vmatpush.msra.mxu0 %v19_v1  ;;  %v612_v7 = vld [vmem:[%s1058_s1 + $0xf8] sm:$0xff]  ;;  %v769_v10 = vld [vmem:[%s1060_s2] ss:$0 sm:$0xff]  ;;  %v607_v15 = vld [vmem:[%s1058_s1 + $0xd0] sm:$0xff] }
   0x5   :  { %278 = vmatpush.msra.mxu1 %v612_v7  ;;  %645 = vmatpush.msra.mxu3 %v612_v7  ;;  %v609_v11 = vld [vmem:[%s1058_s1 + $0xe0] sm:$0xff]  ;;  %v608_v12 = vld [vmem:[%s1058_s1 + $0xd8] sm:$0xff]  ;;  %v606_v17 = vld [vmem:[%s1058_s1 + $0xc8] sm:$0xff] }
   0x6   :  { %87 = vmatpush.msra.mxu0 %v18_v2  ;;  %v605_v19 = vld [vmem:[%s1058_s1 + $0xc0] sm:$0xff]  ;;  %v604_v21 = vld [vmem:[%s1058_s1 + $0xb8] sm:$0xff]  ;;  %v603_v25 = vld [vmem:[%s1058_s1 + $0xb0] sm:$0xff] }
   0x7   :  { %629 = vmatmul.msk.f32.vlgmr.msra.gmra.mxu0 %vm59_vm0, %v14_v3  ;;  %279 = vmatpush.msra.mxu1 %v611_v8  ;;  %v602_v29 = vld [vmem:[%s1058_s1 + $0xa8] sm:$0xff]  ;;  %v601_v33 = vld [vmem:[%s1058_s1 + $0xa0] sm:$0xff]  ;;  %v600_v37 = vld [vmem:[%s1058_s1 + $0x98] sm:$0xff] }
   0x8   :  { %646 = vmatpush.msra.mxu3 %v611_v8  ;;  %v599_v42 = vld [vmem:[%s1058_s1 + $0x90] sm:$0xff]  ;;  %v598_v47 = vld [vmem:[%s1058_s1 + $0x88] sm:$0xff]  ;;  %v597_v52 = vld [vmem:[%s1058_s1 + $0x80] sm:$0xff] }
   0x9   :  { %280 = vmatpush.msra.mxu1 %v610_v9 }
   0xa   :  { %647 = vmatpush.msra.mxu3 %v610_v9 }
   0xb   :  { %281 = vmatpush.msra.mxu1 %v609_v11 }
   0xc   :  { %648 = vmatpush.msra.mxu3 %v609_v11 }
   0xd   :  { %282 = vmatpush.msra.mxu1 %v608_v12 }
   0xe   :  { %649 = vmatpush.msra.mxu3 %v608_v12 }
   0xf   :  { %630 = vmatmul.msk.f32.gmra.mxu0 %vm59_vm0, %v15_v4  ;;  %283 = vmatpush.msra.mxu1 %v607_v15 }
  0x10   :  { %650 = vmatpush.msra.mxu3 %v607_v15 }
  0x11   :  { %284 = vmatpush.msra.mxu1 %v606_v17 }
  0x12   :  { %651 = vmatpush.msra.mxu3 %v606_v17 }
  0x13   :  { %285 = vmatpush.msra.mxu1 %v605_v19 }
  0x14   :  { %652 = vmatpush.msra.mxu3 %v605_v19 }
  0x15   :  { %286 = vmatpush.msra.mxu1 %v604_v21 }
  0x16   :  { %653 = vmatpush.msra.mxu3 %v604_v21 }
  0x17   :  { %631 = vmatmul.msk.f32.gmra.mxu0 %vm59_vm0, %v16_v5  ;;  %287 = vmatpush.msra.mxu1 %v603_v25 }
  0x18   :  { %654 = vmatpush.msra.mxu3 %v603_v25 }
  0x19   :  { %288 = vmatpush.msra.mxu1 %v602_v29 }
  0x1a   :  { %655 = vmatpush.msra.mxu3 %v602_v29 }
  0x1b   :  { %289 = vmatpush.msra.mxu1 %v601_v33 }
  0x1c   :  { %656 = vmatpush.msra.mxu3 %v601_v33 }
  0x1d   :  { %290 = vmatpush.msra.mxu1 %v600_v37 }
  0x1e   :  { %657 = vmatpush.msra.mxu3 %v600_v37 }
  0x1f   :  { %632 = vmatmul.msk.f32.gmra.mxu0 %vm59_vm0, %v17_v6  ;;  %291 = vmatpush.msra.mxu1 %v599_v42 }
  0x20   :  { %658 = vmatpush.msra.mxu3 %v599_v42 }
  0x21   :  { %292 = vmatpush.msra.mxu1 %v598_v47 }
  0x22   :  { %659 = vmatpush.msra.mxu3 %v598_v47 }
  0x23   :  { %293 = vmatpush.msra.mxu1 %v597_v52 }
  0x24   :  { %660 = vmatpush.msra.mxu3 %v597_v52 }
  0x84   :  { %v89_v13 = vpop.f32.mrf.mxu0 }
  0x85   :  { %v778_v14 = vadd.f32 %v769_v10, %v89_v13 }
  0x87   :  { %v784_v16 = vmul.f32 0.70710677, %v778_v14 }
  0x89   :  { %v109_v18 = vmul.f32 %v784_v16, %v784_v16 }
  0x8b   :  { %v794_v20 = vmin.f32 %v109_v18, 16.0 }
  0x8c   :  { %v92_v22 = vpop.f32.mrf.mxu0 }
  0x8d   :  { %v111_v23 = vmul.f32 2.1237322e-06, %v794_v20  ;;  %v801_v24 = vadd.f32 %v769_v10, %v92_v22  ;;  %v122_v26 = vmul.f32 3.8918573e-05, %v794_v20 }
  0x8f   :  { %v112_v27 = vadd.f32 0.00028619796, %v111_v23  ;;  %v808_v28 = vmul.f32 0.70710677, %v801_v24  ;;  %v123_v30 = vadd.f32 0.001143296, %v122_v26 }
  0x91   :  { %v113_v31 = vmul.f32 %v112_v27, %v794_v20  ;;  %v149_v32 = vmul.f32 %v808_v28, %v808_v28  ;;  %v124_v34 = vmul.f32 %v123_v30, %v794_v20 }
  0x93   :  { %v114_v35 = vadd.f32 0.0036580483, %v113_v31  ;;  %v820_v36 = vmin.f32 %v149_v32, 16.0  ;;  %v125_v39 = vadd.f32 0.014752088, %v124_v34 }
  0x94   :  { %v95_v38 = vpop.f32.mrf.mxu0 }
  0x95   :  { %v151_v40 = vmul.f32 2.1237322e-06, %v820_v36  ;;  %v827_v41 = vadd.f32 %v769_v10, %v95_v38  ;;  %v162_v43 = vmul.f32 3.8918573e-05, %v820_v36  ;;  %v126_v44 = vmul.f32 %v125_v39, %v794_v20 }
  0x96   :  { %v115_v45 = vmul.f32 %v114_v35, %v794_v20 }
  0x97   :  { %v152_v46 = vadd.f32 0.00028619796, %v151_v40  ;;  %v839_v48 = vmul.f32 0.70710677, %v827_v41  ;;  %v127_v49 = vadd.f32 0.112945676, %v126_v44 }
  0x98   :  { %v163_v50 = vadd.f32 0.001143296, %v162_v43  ;;  %v116_v56 = vadd.f32 0.05243302, %v115_v45 }
  0x99   :  { %v153_v51 = vmul.f32 %v152_v46, %v820_v36  ;;  %v189_v53 = vmul.f32 %v839_v48, %v839_v48  ;;  %v128_v54 = vmul.f32 %v127_v49, %v794_v20 }
  0x9a   :  { %v164_v55 = vmul.f32 %v163_v50, %v820_v36  ;;  %v117_v3 = vmul.f32 %v116_v56, %v794_v20 }
  0x9b   :  { %v154_v57 = vadd.f32 0.0036580483, %v153_v51  ;;  %v849_v58 = vmin.f32 %v189_v53, 16.0  ;;  %v129_v60 = vadd.f32 0.4994258, %v128_v54 }
  0x9c   :  { %v98_v59 = vpop.f32.mrf.mxu0  ;;  %v165_v61 = vadd.f32 0.014752088, %v164_v55  ;;  %v118_v12 = vadd.f32 0.18741608, %v117_v3 }
  0x9d   :  { %v852_v62 = vadd.f32 %v769_v10, %v98_v59  ;;  %v191_v63 = vmul.f32 2.1237322e-06, %v849_v58  ;;  %v130_v0 = vmul.f32 %v129_v60, %v794_v20  ;;  %v202_v2 = vmul.f32 3.8918573e-05, %v849_v58 }
  0x9e   :  { %v166_v1 = vmul.f32 %v165_v61, %v820_v36  ;;  %v155_v4 = vmul.f32 %v154_v57, %v820_v36  ;;  %v119_v26 = vmul.f32 %v118_v12, %v794_v20 }
  0x9f   :  { %v192_v5 = vadd.f32 0.00028619796, %v191_v63  ;;  %v861_v6 = vmul.f32 0.70710677, %v852_v62  ;;  %v131_v7 = vadd.f32 1.0, %v130_v0 }
  0xa0   :  { %v167_v8 = vadd.f32 0.112945676, %v166_v1  ;;  %v203_v9 = vadd.f32 0.001143296, %v202_v2  ;;  %v156_v15 = vadd.f32 0.05243302, %v155_v4 }
  0xa1   :  { %v193_v10 = vmul.f32 %v192_v5, %v849_v58  ;;  %v229_v11 = vmul.f32 %v861_v6, %v861_v6  ;;  %680 = vrcp.f32 %v131_v7  ;;  %v120_v20 = vadd.f32 1.1283791, %v119_v26 }
  0xa2   :  { %v168_v13 = vmul.f32 %v167_v8, %v820_v36  ;;  %v204_v18 = vmul.f32 %v203_v9, %v849_v58  ;;  %v157_v30 = vmul.f32 %v156_v15, %v820_v36  ;;  %v143_v44 = vand.u32 2147483648, %v131_v7 }
  0xa3   :  { %v867_v17 = vmin.f32 %v229_v11, 16.0  ;;  %v194_v19 = vadd.f32 0.0036580483, %v193_v10  ;;  %v141_v47 = vand.u32 2147483647, %v131_v7  ;;  %vm137_vm2 = vweird.f32 %v131_v7 }
  0xa4   :  { %v169_v21 = vadd.f32 0.4994258, %v168_v13  ;;  %v205_v23 = vadd.f32 0.014752088, %v204_v18  ;;  %v158_v43 = vadd.f32 0.18741608, %v157_v30  ;;  %v121_v55 = vmul.f32 %v120_v20, %v784_v16 }
  0xa5   :  { %v231_v22 = vmul.f32 2.1237322e-06, %v867_v17  ;;  %v242_v25 = vmul.f32 3.8918573e-05, %v867_v17  ;;  %v195_v37 = vmul.f32 %v194_v19, %v849_v58  ;;  %v144_v56 = vor.u32 1.1754944e-38, %v143_v44 }
  0xa6   :  { %v170_v27 = vmul.f32 %v169_v21, %v820_v36  ;;  %v206_v32 = vmul.f32 %v205_v23, %v849_v58  ;;  %v159_v60 = vmul.f32 %v158_v43, %v820_v36  ;;  %vm142_vm4 = vcmp.eq.f32.partialorder %v141_v47, 8.507059e+37 }
  0xa7   :  { %v681_v29 = vpop.eup %680  ;;  %v232_v31 = vadd.f32 0.00028619796, %v231_v22  ;;  %v243_v33 = vadd.f32 0.001143296, %v242_v25  ;;  %v196_v50 = vadd.f32 0.05243302, %v195_v37 }
  0xa8   :  { %v133_v34 = vmul.f32 %v681_v29, %v131_v7  ;;  %v171_v35 = vadd.f32 1.0, %v170_v27  ;;  %v207_v38 = vadd.f32 0.112945676, %v206_v32  ;;  %vm138_vm1 = vweird.f32 %v681_v29 }
  0xa9   :  { %v244_v39 = vmul.f32 %v243_v33, %v867_v17  ;;  %v233_v40 = vmul.f32 %v232_v31, %v867_v17  ;;  %vm139_vm3 = vmor %vm137_vm2, %vm138_vm1  ;;  %v197_v0 = vmul.f32 %v196_v50, %v849_v58  ;;  %v160_v8 = vadd.f32 1.1283791, %v159_v60 }
  0xaa   :  { %v134_v42 = vsub.f32 1.0, %v133_v34  ;;  %682 = vrcp.f32 %v171_v35  ;;  %v208_v45 = vmul.f32 %v207_v38, %v849_v58  ;;  %v183_v10 = vand.u32 2147483648, %v171_v35 }
  0xab   :  { %v245_v49 = vadd.f32 0.014752088, %v244_v39  ;;  %v234_v52 = vadd.f32 0.0036580483, %v233_v40  ;;  %v181_v36 = vand.u32 2147483647, %v171_v35  ;;  %vm177_vm6 = vweird.f32 %v171_v35 }
  0xac   :  { %v135_v46 = vmul.f32 %v681_v29, %v134_v42  ;;  %v209_v51 = vadd.f32 0.4994258, %v208_v45  ;;  %v101_v13 = vmul.f32 0.5, %v778_v14  ;;  %v198_v15 = vadd.f32 0.18741608, %v197_v0 }
  0xad   :  { %v246_v54 = vmul.f32 %v245_v49, %v867_v17  ;;  %v235_v3 = vmul.f32 %v234_v52, %v867_v17  ;;  %v184_v25 = vor.u32 1.1754944e-38, %v183_v10  ;;  %v161_v26 = vmul.f32 %v160_v8, %v808_v28  ;;  %v907_v8 = vld [vmem:[%s1060_s2 + $0x1] ss:$0 sm:$0xff] }
  0xae   :  { %v136_v53 = vadd.f32 %v681_v29, %v135_v46  ;;  %v210_v57 = vmul.f32 %v209_v51, %v849_v58  ;;  %vm182_vm8 = vcmp.eq.f32.partialorder %v181_v36, 8.507059e+37  ;;  %v199_v31 = vmul.f32 %v198_v15, %v849_v58  ;;  %v625_v10 = vld [vmem:[%s1058_s1 + $0x160] sm:$0xff]  ;;  %v624_v36 = vld [vmem:[%s1058_s1 + $0x158] sm:$0xff] }
  0xaf   :  { %v247_v63 = vadd.f32 0.112945676, %v246_v54  ;;  %v236_v18 = vadd.f32 0.05243302, %v235_v3  ;;  %v102_v38 = vmul.f32 0.5, %v801_v24 }
  0xb0   :  { %v683_v59 = vpop.eup %682  ;;  %v140_v61 = vsel %vm139_vm3, %v681_v29, %v136_v53  ;;  %v211_v5 = vadd.f32 1.0, %v210_v57  ;;  %v200_v39 = vadd.f32 1.1283791, %v199_v31 }
  0xb1   :  { %v145_v1 = vsel %vm142_vm4, %v144_v56, %v140_v61  ;;  %v173_v2 = vmul.f32 %v683_v59, %v171_v35  ;;  %v248_v16 = vmul.f32 %v247_v63, %v867_v17  ;;  %vm178_vm5 = vweird.f32 %v683_v59 }
  0xb2   :  { %v146_v4 = vmul.f32 %v145_v1, %v121_v55  ;;  %684 = vrcp.f32 %v211_v5  ;;  %vm179_vm7 = vmor %vm177_vm6, %vm178_vm5  ;;  %v237_v14 = vmul.f32 %v236_v18, %v867_v17  ;;  %v223_v28 = vand.u32 2147483648, %v211_v5  ;;  %v622_v18 = vld [vmem:[%s1058_s1 + $0x148] sm:$0xff] }
  0xb3   :  { %v174_v7 = vsub.f32 1.0, %v173_v2  ;;  %v249_v12 = vadd.f32 0.4994258, %v248_v16  ;;  %v221_v43 = vand.u32 2147483647, %v211_v5  ;;  %vm217_vm10 = vweird.f32 %v211_v5 }
  0xb4   :  { %v633_v9 = vclamps-f32 %v146_v4, 1.0  ;;  %v238_v40 = vadd.f32 0.18741608, %v237_v14  ;;  %v224_v47 = vor.u32 1.1754944e-38, %v223_v28  ;;  %v201_v50 = vmul.f32 %v200_v39, %v839_v48  ;;  %v618_v14 = vld [vmem:[%s1058_s1 + $0x128] sm:$0xff] }
  0xb5   :  { %v175_v11 = vmul.f32 %v683_v59, %v174_v7  ;;  %v250_v22 = vmul.f32 %v249_v12, %v867_v17  ;;  %vm222_vm12 = vcmp.eq.f32.partialorder %v221_v43, 8.507059e+37  ;;  %v615_v43 = vld [vmem:[%s1058_s1 + $0x110] sm:$0xff] }
  0xb6   :  { %v269_v19 = vadd.f32 1.0, %v633_v9  ;;  %v239_v46 = vmul.f32 %v238_v40, %v867_v17  ;;  %v103_v17 = vmul.f32 0.5, %v827_v41  ;;  %v628_v41 = vld [vmem:[%s1058_s1 + $0x178] sm:$0xff] }
  0xb7   :  { %v176_v21 = vadd.f32 %v683_v59, %v175_v11  ;;  %v251_v29 = vadd.f32 1.0, %v250_v22  ;;  %484 = vmatpush.msrb.mxu0 %v628_v41  ;;  %661 = vmatpush.msra.mxu2 %v628_v41  ;;  %v616_v40 = vld [vmem:[%s1058_s1 + $0x118] sm:$0xff] }
  0xb8   :  { %v273_v23 = vmul.f32 %v269_v19, %v101_v13  ;;  %v685_v30 = vpop.eup %684  ;;  %v240_v55 = vadd.f32 1.1283791, %v239_v46  ;;  %v623_v13 = vld [vmem:[%s1058_s1 + $0x150] sm:$0xff] }
  0xb9   :  { %v180_v27 = vsel %vm179_vm7, %v683_v59, %v176_v21  ;;  %v213_v34 = vmul.f32 %v685_v30, %v211_v5  ;;  %686 = vrcp.f32 %v251_v29  ;;  %vm218_vm9 = vweird.f32 %v685_v30  ;;  %v621_v21 = vld [vmem:[%s1058_s1 + $0x140] sm:$0xff] }
  0xba   :  { %294 = vmatmul.f32.vlgmr.msra.gmra.mxu1 %v273_v23  ;;  %v185_v32 = vsel %vm182_vm8, %v184_v25, %v180_v27  ;;  %vm219_vm11 = vmor %vm217_vm10, %vm218_vm9  ;;  %v263_v54 = vand.u32 2147483648, %v251_v29  ;;  %v261_v57 = vand.u32 2147483647, %v251_v29  ;;  %vm257_vm14 = vweird.f32 %v251_v29  ;;  %v620_v25 = vld [vmem:[%s1058_s1 + $0x138] sm:$0xff] }
  0xbb   :  { %v186_v33 = vmul.f32 %v185_v32, %v161_v26  ;;  %v214_v37 = vsub.f32 1.0, %v213_v34  ;;  %v241_v48 = vmul.f32 %v240_v55, %v861_v6  ;;  %v104_v5 = vmul.f32 0.5, %v852_v62  ;;  %v627_v6 = vld [vmem:[%s1058_s1 + $0x170] sm:$0xff]  ;;  %v626_v62 = vld [vmem:[%s1058_s1 + $0x168] sm:$0xff] }
  0xbc   :  { %v264_v63 = vor.u32 1.1754944e-38, %v263_v54  ;;  %vm262_vm1 = vcmp.eq.f32.partialorder %v261_v57, 8.507059e+37  ;;  %485 = vmatpush.msrb.mxu0 %v627_v6  ;;  %662 = vmatpush.msra.mxu2 %v627_v6 }
  0xbd   :  { %v634_v35 = vclamps-f32 %v186_v33, 1.0  ;;  %v215_v20 = vmul.f32 %v685_v30, %v214_v37  ;;  %v617_v37 = vld [vmem:[%s1058_s1 + $0x120] sm:$0xff] }
  0xbe   :  { %486 = vmatpush.msrb.mxu0 %v626_v62  ;;  %663 = vmatpush.msra.mxu2 %v626_v62 }
  0xbf   :  { %v270_v42 = vadd.f32 1.0, %v634_v35  ;;  %v687_v44 = vpop.eup %686  ;;  %v216_v45 = vadd.f32 %v685_v30, %v215_v20 }
  0xc0   :  { %v253_v49 = vmul.f32 %v687_v44, %v251_v29  ;;  %vm258_vm13 = vweird.f32 %v687_v44  ;;  %487 = vmatpush.msrb.mxu0 %v625_v10  ;;  %664 = vmatpush.msra.mxu2 %v625_v10  ;;  %v619_v29 = vld [vmem:[%s1058_s1 + $0x130] sm:$0xff] }
  0xc1   :  { %v274_v58 = vmul.f32 %v270_v42, %v102_v38  ;;  %v220_v24 = vsel %vm219_vm11, %v685_v30, %v216_v45  ;;  %vm259_vm15 = vmor %vm257_vm14, %vm258_vm13  ;;  %v614_v45 = vld [vmem:[%s1058_s1 + $0x108] sm:$0xff] }
  0xc2   :  { %v225_v51 = vsel %vm222_vm12, %v224_v47, %v220_v24  ;;  %v254_v52 = vsub.f32 1.0, %v253_v49  ;;  %488 = vmatpush.msrb.mxu0 %v624_v36  ;;  %665 = vmatpush.msra.mxu2 %v624_v36 }
  0xc3   :  { %297 = vmatmul.f32.vlgmr.msra.gmra.mxu3 %v274_v58  ;;  %v226_v53 = vmul.f32 %v225_v51, %v201_v50  ;;  %v613_v50 = vld [vmem:[%s1058_s1 + $0x100] sm:$0xff] }
  0xc4   :  { %v255_v56 = vmul.f32 %v687_v44, %v254_v52  ;;  %489 = vmatpush.msrb.mxu0 %v623_v13  ;;  %666 = vmatpush.msra.mxu2 %v623_v13 }
  0xc5   :  { %v635_v59 = vclamps-f32 %v226_v53, 1.0 }
  0xc6   :  { %v256_v60 = vadd.f32 %v687_v44, %v255_v56  ;;  %490 = vmatpush.msrb.mxu0 %v622_v18  ;;  %667 = vmatpush.msra.mxu2 %v622_v18 }
  0xc7   :  { %v271_v61 = vadd.f32 1.0, %v635_v59 }
  0xc8   :  { %v260_v0 = vsel %vm259_vm15, %v687_v44, %v256_v60  ;;  %491 = vmatpush.msrb.mxu0 %v621_v21  ;;  %668 = vmatpush.msra.mxu2 %v621_v21 }
  0xc9   :  { %v275_v1 = vmul.f32 %v271_v61, %v103_v17  ;;  %v265_v2 = vsel %vm262_vm1, %v264_v63, %v260_v0 }
  0xca   :  { %v266_v3 = vmul.f32 %v265_v2, %v241_v48  ;;  %492 = vmatpush.msrb.mxu0 %v620_v25  ;;  %669 = vmatpush.msra.mxu2 %v620_v25 }
  0xcb   :  { %300 = vmatmul.f32.gmra.mxu3 %v275_v1 }
  0xcc   :  { %v636_v4 = vclamps-f32 %v266_v3, 1.0  ;;  %493 = vmatpush.msrb.mxu0 %v619_v29  ;;  %670 = vmatpush.msra.mxu2 %v619_v29 }
  0xce   :  { %v272_v16 = vadd.f32 1.0, %v636_v4  ;;  %494 = vmatpush.msrb.mxu0 %v618_v14  ;;  %671 = vmatpush.msra.mxu2 %v618_v14 }
  0xd0   :  { %v276_v7 = vmul.f32 %v272_v16, %v104_v5  ;;  %495 = vmatpush.msrb.mxu0 %v617_v37  ;;  %672 = vmatpush.msra.mxu2 %v617_v37 }
  0xd2   :  { %496 = vmatpush.msrb.mxu0 %v616_v40  ;;  %673 = vmatpush.msra.mxu2 %v616_v40 }
  0xd3   :  { %303 = vmatmul.f32.gmra.mxu3 %v276_v7 }
  0xd4   :  { %497 = vmatpush.msrb.mxu0 %v615_v43  ;;  %674 = vmatpush.msra.mxu2 %v615_v43 }
  0xd6   :  { %498 = vmatpush.msrb.mxu0 %v614_v45  ;;  %675 = vmatpush.msra.mxu2 %v614_v45 }
  0xd8   :  { %499 = vmatpush.msrb.mxu0 %v613_v50  ;;  %676 = vmatpush.msra.mxu2 %v613_v50 }
 0x137   :  { %v295_v9 = vpop.f32.mrf.mxu1 }
 0x138   :  { %v916_v11 = vadd.f32 %v907_v8, %v295_v9 }
 0x13a   :  { %v922_v12 = vmul.f32 0.70710677, %v916_v11 }
 0x13c   :  { %v315_v15 = vmul.f32 %v922_v12, %v922_v12 }
 0x13e   :  { %v932_v19 = vmin.f32 %v315_v15, 16.0 }
 0x140   :  { %v317_v22 = vmul.f32 2.1237322e-06, %v932_v19  ;;  %v328_v23 = vmul.f32 3.8918573e-05, %v932_v19 }
 0x142   :  { %v318_v26 = vadd.f32 0.00028619796, %v317_v22  ;;  %v329_v27 = vadd.f32 0.001143296, %v328_v23 }
 0x144   :  { %v319_v30 = vmul.f32 %v318_v26, %v932_v19  ;;  %v330_v31 = vmul.f32 %v329_v27, %v932_v19 }
 0x146   :  { %v320_v32 = vadd.f32 0.0036580483, %v319_v30  ;;  %v331_v33 = vadd.f32 0.014752088, %v330_v31  ;;  %v298_v34 = vpop.f32.mrf.mxu3 }
 0x147   :  { %v951_v35 = vadd.f32 %v907_v8, %v298_v34 }
 0x148   :  { %v332_v38 = vmul.f32 %v331_v33, %v932_v19  ;;  %v321_v28 = vmul.f32 %v320_v32, %v932_v19 }
 0x149   :  { %v958_v39 = vmul.f32 0.70710677, %v951_v35 }
 0x14a   :  { %v333_v42 = vadd.f32 0.112945676, %v332_v38  ;;  %v322_v46 = vadd.f32 0.05243302, %v321_v28 }
 0x14b   :  { %v355_v20 = vmul.f32 %v958_v39, %v958_v39 }
 0x14c   :  { %v334_v44 = vmul.f32 %v333_v42, %v932_v19  ;;  %v323_v56 = vmul.f32 %v322_v46, %v932_v19 }
 0x14d   :  { %v970_v58 = vmin.f32 %v355_v20, 16.0 }
 0x14e   :  { %v335_v47 = vadd.f32 0.4994258, %v334_v44  ;;  %v301_v52 = vpop.f32.mrf.mxu3  ;;  %v324_v48 = vadd.f32 0.18741608, %v323_v56 }
 0x14f   :  { %v357_v49 = vmul.f32 2.1237322e-06, %v970_v58  ;;  %v368_v24 = vmul.f32 3.8918573e-05, %v970_v58  ;;  %v982_v54 = vadd.f32 %v907_v8, %v301_v52 }
 0x150   :  { %v336_v51 = vmul.f32 %v335_v47, %v932_v19  ;;  %v325_v41 = vmul.f32 %v324_v48, %v932_v19 }
 0x151   :  { %v358_v53 = vadd.f32 0.00028619796, %v357_v49  ;;  %v369_v55 = vadd.f32 0.001143296, %v368_v24  ;;  %v987_v60 = vmul.f32 0.70710677, %v982_v54 }
 0x152   :  { %v337_v57 = vadd.f32 1.0, %v336_v51  ;;  %v326_v22 = vadd.f32 1.1283791, %v325_v41 }
 0x153   :  { %v359_v59 = vmul.f32 %v358_v53, %v970_v58  ;;  %v370_v17 = vmul.f32 %v369_v55, %v970_v58  ;;  %v395_v61 = vmul.f32 %v987_v60, %v987_v60  ;;  %v307_v55 = vmul.f32 0.5, %v916_v11 }
 0x154   :  { %688 = vrcp.f32 %v337_v57  ;;  %v349_v21 = vand.u32 2147483648, %v337_v57  ;;  %v347_v27 = vand.u32 2147483647, %v337_v57  ;;  %vm343_vm3 = vweird.f32 %v337_v57 }
 0x155   :  { %v371_v63 = vadd.f32 0.014752088, %v370_v17  ;;  %v360_v0 = vadd.f32 0.0036580483, %v359_v59  ;;  %v992_v1 = vmin.f32 %v395_v61, 16.0  ;;  %v327_v42 = vmul.f32 %v326_v22, %v922_v12 }
 0x156   :  { %v304_v3 = vpop.f32.mrf.mxu3  ;;  %v350_v33 = vor.u32 1.1754944e-38, %v349_v21  ;;  %vm348_vm5 = vcmp.eq.f32.partialorder %v347_v27, 8.507059e+37 }
 0x157   :  { %v372_v2 = vmul.f32 %v371_v63, %v970_v58  ;;  %v397_v4 = vmul.f32 2.1237322e-06, %v992_v1  ;;  %v997_v5 = vadd.f32 %v907_v8, %v304_v3  ;;  %v408_v6 = vmul.f32 3.8918573e-05, %v992_v1 }
 0x158   :  { %v361_v9 = vmul.f32 %v360_v0, %v970_v58 }
 0x159   :  { %v373_v16 = vadd.f32 0.112945676, %v372_v2  ;;  %v398_v10 = vadd.f32 0.00028619796, %v397_v4  ;;  %v1003_v36 = vmul.f32 0.70710677, %v997_v5 }
 0x15a   :  { %v689_v7 = vpop.eup %688  ;;  %v409_v15 = vadd.f32 0.001143296, %v408_v6  ;;  %v362_v29 = vadd.f32 0.05243302, %v361_v9 }
 0x15b   :  { %v339_v62 = vmul.f32 %v689_v7, %v337_v57  ;;  %v374_v13 = vmul.f32 %v373_v16, %v970_v58  ;;  %v399_v8 = vmul.f32 %v398_v10, %v992_v1  ;;  %v435_v19 = vmul.f32 %v1003_v36, %v1003_v36 }
 0x15c   :  { %v410_v25 = vmul.f32 %v409_v15, %v992_v1  ;;  %vm344_vm2 = vweird.f32 %v689_v7  ;;  %v363_v43 = vmul.f32 %v362_v29, %v970_v58 }
 0x15d   :  { %v340_v18 = vsub.f32 1.0, %v339_v62  ;;  %v375_v23 = vadd.f32 0.4994258, %v374_v13  ;;  %v1010_v30 = vmin.f32 %v435_v19, 16.0  ;;  %v400_v34 = vadd.f32 0.0036580483, %v399_v8  ;;  %vm345_vm4 = vmor %vm343_vm3, %vm344_vm2 }
 0x15e   :  { %v411_v14 = vadd.f32 0.014752088, %v410_v25  ;;  %v364_v24 = vadd.f32 0.18741608, %v363_v43 }
 0x15f   :  { %v341_v26 = vmul.f32 %v689_v7, %v340_v18  ;;  %v376_v31 = vmul.f32 %v375_v23, %v970_v58  ;;  %v437_v37 = vmul.f32 2.1237322e-06, %v1010_v30  ;;  %v448_v28 = vmul.f32 3.8918573e-05, %v1010_v30 }
 0x160   :  { %v412_v40 = vmul.f32 %v411_v14, %v992_v1  ;;  %v401_v47 = vmul.f32 %v400_v34, %v992_v1  ;;  %v365_v63 = vmul.f32 %v364_v24, %v970_v58 }
 0x161   :  { %v342_v32 = vadd.f32 %v689_v7, %v341_v26  ;;  %v377_v38 = vadd.f32 1.0, %v376_v31  ;;  %v438_v45 = vadd.f32 0.00028619796, %v437_v37  ;;  %v449_v50 = vadd.f32 0.001143296, %v448_v28 }
 0x162   :  { %v413_v49 = vadd.f32 0.112945676, %v412_v40  ;;  %v402_v59 = vadd.f32 0.05243302, %v401_v47  ;;  %v366_v62 = vadd.f32 1.1283791, %v365_v63 }
 0x163   :  { %v346_v20 = vsel %vm345_vm4, %v689_v7, %v342_v32  ;;  %690 = vrcp.f32 %v377_v38  ;;  %v439_v52 = vmul.f32 %v438_v45, %v1010_v30  ;;  %v450_v12 = vmul.f32 %v449_v50, %v1010_v30 }
 0x164   :  { %v351_v44 = vsel %vm348_vm5, %v350_v33, %v346_v20  ;;  %v414_v53 = vmul.f32 %v413_v49, %v992_v1  ;;  %v403_v7 = vmul.f32 %v402_v59, %v992_v1  ;;  %v389_v41 = vand.u32 2147483648, %v377_v38 }
 0x165   :  { %v352_v46 = vmul.f32 %v351_v44, %v327_v42  ;;  %v451_v61 = vadd.f32 0.014752088, %v450_v12  ;;  %v440_v2 = vadd.f32 0.0036580483, %v439_v52  ;;  %v387_v10 = vand.u32 2147483647, %v377_v38 }
 0x166   :  { %v415_v17 = vadd.f32 0.4994258, %v414_v53  ;;  %vm383_vm7 = vweird.f32 %v377_v38  ;;  %v404_v18 = vadd.f32 0.18741608, %v403_v7  ;;  %v390_v21 = vor.u32 1.1754944e-38, %v389_v41 }
 0x167   :  { %v637_v51 = vclamps-f32 %v352_v46, 1.0  ;;  %v452_v4 = vmul.f32 %v451_v61, %v1010_v30  ;;  %v441_v58 = vmul.f32 %v440_v2, %v1010_v30  ;;  %v367_v8 = vmul.f32 %v366_v62, %v958_v39 }
 0x168   :  { %v416_v3 = vmul.f32 %v415_v17, %v992_v1  ;;  %vm388_vm9 = vcmp.eq.f32.partialorder %v387_v10, 8.507059e+37  ;;  %v405_v31 = vmul.f32 %v404_v18, %v992_v1  ;;  %v308_v37 = vmul.f32 0.5, %v951_v35 }
 0x169   :  { %v475_v56 = vadd.f32 1.0, %v637_v51  ;;  %v691_v57 = vpop.eup %690  ;;  %v453_v6 = vadd.f32 0.112945676, %v452_v4  ;;  %v442_v23 = vadd.f32 0.05243302, %v441_v58  ;;  %v309_v59 = vmul.f32 0.5, %v982_v54 }
 0x16a   :  { %v379_v0 = vmul.f32 %v691_v57, %v377_v38  ;;  %v417_v11 = vadd.f32 1.0, %v416_v3  ;;  %vm384_vm6 = vweird.f32 %v691_v57  ;;  %v406_v40 = vadd.f32 1.1283791, %v405_v31  ;;  %v679_v54 = vld [vmem:[%s1060_s2 + $0x2] ss:$0 sm:$0xff] }
 0x16b   :  { %v479_v48 = vmul.f32 %v475_v56, %v307_v55  ;;  %v454_v15 = vmul.f32 %v453_v6, %v1010_v30  ;;  %vm385_vm8 = vmor %vm383_vm7, %vm384_vm6  ;;  %v443_v34 = vmul.f32 %v442_v23, %v1010_v30  ;;  %v310_v4 = vmul.f32 0.5, %v997_v5 }
 0x16c   :  { %v380_v16 = vsub.f32 1.0, %v379_v0  ;;  %692 = vrcp.f32 %v417_v11  ;;  %v429_v28 = vand.u32 2147483648, %v417_v11  ;;  %v427_v43 = vand.u32 2147483647, %v417_v11 }
 0x16d   :  { %500 = vmatmul.f32.vlgmr.msrb.gmra.mxu0 %v479_v48  ;;  %v455_v19 = vadd.f32 0.4994258, %v454_v15  ;;  %v444_v44 = vadd.f32 0.18741608, %v443_v34  ;;  %vm423_vm11 = vweird.f32 %v417_v11  ;;  %v407_v47 = vmul.f32 %v406_v40, %v987_v60 }
 0x16e   :  { %v381_v9 = vmul.f32 %v691_v57, %v380_v16  ;;  %v430_v1 = vor.u32 1.1754944e-38, %v429_v28  ;;  %vm428_vm13 = vcmp.eq.f32.partialorder %v427_v43, 8.507059e+37 }
 0x16f   :  { %v456_v27 = vmul.f32 %v455_v19, %v1010_v30  ;;  %v445_v35 = vmul.f32 %v444_v44, %v1010_v30 }
 0x170   :  { %v382_v13 = vadd.f32 %v691_v57, %v381_v9 }
 0x171   :  { %v457_v33 = vadd.f32 1.0, %v456_v27  ;;  %v446_v55 = vadd.f32 1.1283791, %v445_v35 }
 0x172   :  { %v386_v22 = vsel %vm385_vm8, %v691_v57, %v382_v13  ;;  %v693_v29 = vpop.eup %692 }
 0x173   :  { %v391_v25 = vsel %vm388_vm9, %v390_v21, %v386_v22  ;;  %v419_v32 = vmul.f32 %v693_v29, %v417_v11  ;;  %694 = vrcp.f32 %v457_v33  ;;  %vm424_vm10 = vweird.f32 %v693_v29 }
 0x174   :  { %v392_v26 = vmul.f32 %v391_v25, %v367_v8  ;;  %vm425_vm12 = vmor %vm423_vm11, %vm424_vm10  ;;  %v469_v12 = vand.u32 2147483648, %v457_v33  ;;  %v467_v57 = vand.u32 2147483647, %v457_v33  ;;  %vm463_vm15 = vweird.f32 %v457_v33 }
 0x175   :  { %v420_v39 = vsub.f32 1.0, %v419_v32  ;;  %v447_v30 = vmul.f32 %v446_v55, %v1003_v36 }
 0x176   :  { %v638_v14 = vclamps-f32 %v392_v26, 1.0  ;;  %v470_v63 = vor.u32 1.1754944e-38, %v469_v12  ;;  %vm468_vm2 = vcmp.eq.f32.partialorder %v467_v57, 8.507059e+37 }
 0x177   :  { %v421_v20 = vmul.f32 %v693_v29, %v420_v39 }
 0x178   :  { %v476_v38 = vadd.f32 1.0, %v638_v14 }
 0x179   :  { %v422_v45 = vadd.f32 %v693_v29, %v421_v20  ;;  %v695_v46 = vpop.eup %694 }
 0x17a   :  { %v480_v42 = vmul.f32 %v476_v38, %v308_v37  ;;  %v459_v24 = vmul.f32 %v695_v46, %v457_v33  ;;  %vm464_vm14 = vweird.f32 %v695_v46 }
 0x17b   :  { %v426_v49 = vsel %vm425_vm12, %v693_v29, %v422_v45  ;;  %vm465_vm1 = vmor %vm463_vm15, %vm464_vm14 }
 0x17c   :  { %503 = vmatmul.f32.vlgmr.msra.gmra.mxu2 %v480_v42  ;;  %v431_v50 = vsel %vm428_vm13, %v430_v1, %v426_v49  ;;  %v460_v52 = vsub.f32 1.0, %v459_v24 }
 0x17d   :  { %v432_v51 = vmul.f32 %v431_v50, %v407_v47 }
 0x17e   :  { %v461_v56 = vmul.f32 %v695_v46, %v460_v52 }
 0x17f   :  { %v639_v53 = vclamps-f32 %v432_v51, 1.0 }
 0x180   :  { %v462_v61 = vadd.f32 %v695_v46, %v461_v56 }
 0x181   :  { %v477_v17 = vadd.f32 1.0, %v639_v53 }
 0x182   :  { %v466_v48 = vsel %vm465_vm1, %v695_v46, %v462_v61 }
 0x183   :  { %v481_v60 = vmul.f32 %v477_v17, %v309_v59  ;;  %v471_v0 = vsel %vm468_vm2, %v470_v63, %v466_v48 }
 0x184   :  { %v472_v2 = vmul.f32 %v471_v0, %v447_v30 }
 0x185   :  { %506 = vmatmul.f32.gmra.mxu2 %v481_v60 }
 0x186   :  { %v640_v3 = vclamps-f32 %v472_v2, 1.0 }
 0x188   :  { %v478_v16 = vadd.f32 1.0, %v640_v3 }
 0x18a   :  { %v482_v7 = vmul.f32 %v478_v16, %v310_v4 }
 0x18d   :  { %509 = vmatmul.f32.gmra.mxu2 %v482_v7 }
 0x1ea   :  { %v501_v41 = vpop.f32.mrf.mxu0 }
 0x1eb   :  { %v502_v11 = vadd.f32 %v679_v54, %v501_v41 }
 0x1ed   :  { %v641_v6 = vmul.f32 -1.442695, %v502_v11 }
 0x1ef   :  { %696 = vpow2.f32 %v641_v6 }
 0x1f5   :  { %v697_v36 = vpop.eup %696 }
 0x1f6   :  { %v525_v62 = vadd.f32 1.0, %v697_v36 }
 0x1f8   :  { %698 = vrcp.f32 %v525_v62  ;;  %v540_v5 = vand.u32 2147483648, %v525_v62  ;;  %v538_v21 = vand.u32 2147483647, %v525_v62  ;;  %vm534_vm4 = vweird.f32 %v525_v62 }
 0x1fa   :  { %v541_v19 = vor.u32 1.1754944e-38, %v540_v5  ;;  %vm539_vm6 = vcmp.eq.f32.partialorder %v538_v21, 8.507059e+37 }
 0x1fe   :  { %v699_v9 = vpop.eup %698 }
 0x1ff   :  { %v530_v10 = vmul.f32 %v699_v9, %v525_v62  ;;  %v504_v58 = vpop.f32.mrf.mxu2  ;;  %vm535_vm3 = vweird.f32 %v699_v9 }
 0x200   :  { %v505_v15 = vadd.f32 %v679_v54, %v504_v58  ;;  %vm536_vm5 = vmor %vm534_vm4, %vm535_vm3 }
 0x201   :  { %v531_v13 = vsub.f32 1.0, %v530_v10 }
 0x202   :  { %v642_v8 = vmul.f32 -1.442695, %v505_v15 }
 0x203   :  { %v532_v18 = vmul.f32 %v699_v9, %v531_v13 }
 0x204   :  { %700 = vpow2.f32 %v642_v8 }
 0x205   :  { %v533_v22 = vadd.f32 %v699_v9, %v532_v18 }
 0x207   :  { %v537_v23 = vsel %vm536_vm5, %v699_v9, %v533_v22 }
 0x208   :  { %v542_v25 = vsel %vm539_vm6, %v541_v19, %v537_v23  ;;  %v507_v29 = vpop.f32.mrf.mxu2 }
 0x209   :  { %589 = vst.msk [vmem:[%s1061_s3] sm:$0xff] %vm59_vm0, %v542_v25  ;;  %v508_v31 = vadd.f32 %v679_v54, %v507_v29 }
 0x20a   :  { %v701_v26 = vpop.eup %700 }
 0x20b   :  { %v526_v27 = vadd.f32 1.0, %v701_v26  ;;  %v643_v14 = vmul.f32 -1.442695, %v508_v31 }
 0x20d   :  { %702 = vrcp.f32 %v526_v27  ;;  %v555_v40 = vand.u32 2147483648, %v526_v27  ;;  %v553_v43 = vand.u32 2147483647, %v526_v27  ;;  %vm549_vm8 = vweird.f32 %v526_v27 }
 0x20e   :  { %704 = vpow2.f32 %v643_v14 }
 0x20f   :  { %v556_v45 = vor.u32 1.1754944e-38, %v555_v40  ;;  %vm554_vm10 = vcmp.eq.f32.partialorder %v553_v43, 8.507059e+37 }
 0x210   :  { %v510_v34 = vpop.f32.mrf.mxu2 }
 0x211   :  { %v511_v37 = vadd.f32 %v679_v54, %v510_v34 }
 0x213   :  { %v703_v32 = vpop.eup %702  ;;  %v644_v42 = vmul.f32 -1.442695, %v511_v37 }
 0x214   :  { %v545_v33 = vmul.f32 %v703_v32, %v526_v27  ;;  %v705_v38 = vpop.eup %704  ;;  %vm550_vm7 = vweird.f32 %v703_v32 }
 0x215   :  { %v527_v28 = vadd.f32 1.0, %v705_v38  ;;  %vm551_vm9 = vmor %vm549_vm8, %vm550_vm7 }
 0x216   :  { %v546_v39 = vsub.f32 1.0, %v545_v33 }
 0x217   :  { %706 = vrcp.f32 %v527_v28  ;;  %v570_v51 = vand.u32 2147483648, %v527_v28  ;;  %v568_v53 = vand.u32 2147483647, %v527_v28  ;;  %vm564_vm12 = vweird.f32 %v527_v28 }
 0x218   :  { %v547_v20 = vmul.f32 %v703_v32, %v546_v39  ;;  %708 = vpow2.f32 %v644_v42 }
 0x219   :  { %v571_v55 = vor.u32 1.1754944e-38, %v570_v51  ;;  %vm569_vm14 = vcmp.eq.f32.partialorder %v568_v53, 8.507059e+37 }
 0x21a   :  { %v548_v44 = vadd.f32 %v703_v32, %v547_v20 }
 0x21c   :  { %v552_v1 = vsel %vm551_vm9, %v703_v32, %v548_v44 }
 0x21d   :  { %v557_v46 = vsel %vm554_vm10, %v556_v45, %v552_v1  ;;  %v707_v47 = vpop.eup %706 }
 0x21e   :  { %590 = vst.msk [vmem:[%s1061_s3 + $0x8] sm:$0xff] %vm59_vm0, %v557_v46  ;;  %v709_v49 = vpop.eup %708  ;;  %v560_v35 = vmul.f32 %v707_v47, %v527_v28  ;;  %vm565_vm11 = vweird.f32 %v707_v47 }
 0x21f   :  { %v528_v50 = vadd.f32 1.0, %v709_v49  ;;  %vm566_vm13 = vmor %vm564_vm12, %vm565_vm11 }
 0x220   :  { %v561_v24 = vsub.f32 1.0, %v560_v35 }
 0x221   :  { %710 = vrcp.f32 %v528_v50  ;;  %v585_v60 = vand.u32 2147483648, %v528_v50  ;;  %v583_v30 = vand.u32 2147483647, %v528_v50  ;;  %vm579_vm1 = vweird.f32 %v528_v50 }
 0x222   :  { %v562_v52 = vmul.f32 %v707_v47, %v561_v24 }
 0x223   :  { %v586_v0 = vor.u32 1.1754944e-38, %v585_v60  ;;  %vm584_vm3 = vcmp.eq.f32.partialorder %v583_v30, 8.507059e+37 }
 0x224   :  { %v563_v12 = vadd.f32 %v707_v47, %v562_v52 }
 0x226   :  { %v567_v56 = vsel %vm566_vm13, %v707_v47, %v563_v12 }
 0x227   :  { %v711_v57 = vpop.eup %710  ;;  %v572_v59 = vsel %vm569_vm14, %v571_v55, %v567_v56 }
 0x228   :  { %591 = vst.msk [vmem:[%s1061_s3 + $0x10] sm:$0xff] %vm59_vm0, %v572_v59  ;;  %v575_v17 = vmul.f32 %v711_v57, %v528_v50  ;;  %vm580_vm15 = vweird.f32 %v711_v57 }
 0x229   :  { %vm581_vm2 = vmor %vm579_vm1, %vm580_vm15 }
 0x22a   :  { %v576_v61 = vsub.f32 1.0, %v575_v17 }
 0x22c   :  { %v577_v63 = vmul.f32 %v711_v57, %v576_v61 }
 0x22e   :  { %v578_v48 = vadd.f32 %v711_v57, %v577_v63 }
 0x230   :  { %v582_v2 = vsel %vm581_vm2, %v711_v57, %v578_v48 }
 0x231   :  { %v587_v3 = vsel %vm584_vm3, %v586_v0, %v582_v2 }
 0x232   :  { %592 = vst.msk [vmem:[%s1061_s3 + $0x18] sm:$0xff] %vm59_vm0, %v587_v3 }

</bundles_post_ra>
